<compile_context>
chip_gen: v7x
topology: tpu7x:2x2x1
jax: 0.10.0
libtpu: 0.0.40
codegen_flags: <defaults>
</compile_context>

<pallas_src>
import jax
import jax.numpy as jnp
from jax.experimental import pallas as pl
from jax.experimental.pallas import tpu as pltpu

# ---- model config (mirrors PCNN.__init__ defaults: kernel_size=1, num_layers=4) ----
IN_CH = 4          # in_channels
HIDDEN = 32        # hidden_channels
OUT_CH = 8         # out_channels
T_IN = 8           # input_time_len
T_OUT = 4          # output_time_len
NUM_LAYERS = 4
DROPOUT_P = 0.2    # see TODO(synk) below

# ---- example input config ----
B = 2              # batch
N_NODES = 8        # num_nodes
FEAT = 6           # raw feature dim; forward slices x[..., :IN_CH]

# The raw `.view(B, N, -1)` row/channel alignment used by the fold requires
# OUT_CH == N_NODES (true for this config).
assert OUT_CH == N_NODES, "raw-view row/channel alignment requires OUT_CH == N_NODES"

IN_FLAT = N_NODES * T_IN * FEAT        # 384
OUT_FLAT = OUT_CH * T_OUT * 3          # 96


# ------------------------------ fused forward kernel --------------------------------
def pcnn_fused_kernel(x_ref, w_ref, b_ref, o_ref):
    # x_ref: (B, IN_FLAT)        raw-flattened input (row order n, t, feat)
    # w_ref: (IN_FLAT, OUT_FLAT) full-model folded weight (zero rows for unused feats)
    # b_ref: (1, OUT_FLAT)       full-model folded bias
    # o_ref: (B, OUT_FLAT)       flattened output (col order n, t_out, 3)
    #
    # TODO(synk): F.dropout(p=0.2, training=True torch default) is stochastic; applied
    # as identity (eval semantics) since torch RNG cannot be reproduced.
    o_ref[...] = (jnp.dot(x_ref[...], w_ref[...], preferred_element_type=jnp.float32)
                  + b_ref[...])


# ------------------------------------ wrapper ---------------------------------------
def pcnn_forward(x, folded):
    # Free metadata reshapes only — no slice / transpose XLA launches.
    x_flat = x.reshape(B, IN_FLAT)                               # (B, 384)
    out_flat = pl.pallas_call(
        pcnn_fused_kernel,
        out_shape=jax.ShapeDtypeStruct((B, OUT_FLAT), jnp.float32),
        in_specs=[pl.BlockSpec(memory_space=pltpu.MemorySpace.VMEM)] * 3,
        out_specs=pl.BlockSpec(memory_space=pltpu.MemorySpace.VMEM),
    )(x_flat, folded["w_total"], folded["b_total"])
    return out_flat.reshape(B, N_NODES, T_OUT, 3)


# ------------------------- one-time algebraic weight fold ---------------------------
def fold_params(params):
    """Fold the purely-linear PCNN into one (IN_FLAT, OUT_FLAT) matrix + bias.

    Valid only while dropout is identity and there are no nonlinearities — exactly the
    semantics of the reference module's forward (with dropout in eval mode).

    Derivation (per batch sample, j = t*N + n, row r of the raw view == channel r):
      y[n,t,o]    = sum_c xc[n,t,c] * w_eff[c,o] + b_eff[o]          (begin->cnn->ln)
      v[r,j]      = y[n,t,r]                                         (permute + view)
      e[r,k]      = sum_j v[r,j] * we[j,k] + be[k]                   (endconv)
      out[r,k,m]  = e[r,k] * w1[m] + b1[m]                           (end1)
    =>
      W_total[(n,t,c),(r,k,m)] = w_eff[c,r] * we[t*N+n, k] * w1[m]   (0 for c >= IN_CH)
      b_total[(r,k,m)]         = (b_eff[r]*sum_j we[j,k] + be[k]) * w1[m] + b1[m]
    """
    # 1) fold begin_conv -> cnn[0..3] -> ln into (IN_CH, OUT_CH) + (OUT_CH,)
    w_eff = params["wb"]                                   # (IN_CH, HIDDEN)
    b_eff = params["bb"]                                   # (1, HIDDEN)
    for i in range(NUM_LAYERS):
        w_eff = w_eff @ params["wcnn"][i]
        b_eff = b_eff @ params["wcnn"][i] + params["bcnn"][i]
    w_eff = w_eff @ params["wln"]                          # (IN_CH, OUT_CH)
    b_eff = (b_eff @ params["wln"] + params["bln"])[0]     # (OUT_CH,)

    we = params["we"]                                      # (T_IN*N_NODES, T_OUT)
    be = params["be"][0]                                   # (T_OUT,)
    w1 = params["w1"][0]                                   # (3,)
    b1 = params["b1"][0]                                   # (3,)
    we_tn = we.reshape(T_IN, N_NODES, T_OUT)               # [t, n, k]

    # 2) full weight: W6[n, t, c, r, k, m] = w_eff[c,r] * we_tn[t,n,k] * w1[m]
    w6 = jnp.einsum('cr,tnk,m->ntcrkm', w_eff, we_tn, w1)  # (N, T, IN_CH, OUT, T_OUT, 3)
    # zero rows for the unused raw features [IN_CH:FEAT] (absorbs x[..., :IN_CH])
    w6 = jnp.pad(w6, ((0, 0), (0, 0), (0, FEAT - IN_CH), (0, 0), (0, 0), (0, 0)))
    w_total = w6.reshape(IN_FLAT, OUT_FLAT)                # (384, 96)

    # 3) full bias
    s = we.sum(axis=0)                                     # (T_OUT,)  sum_j we[j,k]
    b3 = (b_eff[:, None, None] * s[None, :, None]
          + be[None, :, None]) * w1[None, None, :] + b1[None, None, :]
    b_total = b3.reshape(1, OUT_FLAT)                      # (1, 96)

    return {"w_total": w_total, "b_total": b_total}


# ------------------------------ pure-JAX reference ----------------------------------
def pcnn_reference(x, params):
    xc = x[..., :IN_CH]
    h = xc @ params["wb"] + params["bb"][0]
    for i in range(NUM_LAYERS):
        h = h @ params["wcnn"][i] + params["bcnn"][i, 0]
    y = h @ params["wln"] + params["bln"][0]                 # (B, N, T, OUT_CH)
    y_nchw = jnp.transpose(y, (0, 3, 2, 1))                  # (B, OUT_CH, T, N)
    v = y_nchw.reshape(B, N_NODES, T_IN * OUT_CH)            # == torch .view(B, N, -1)
    e = v @ params["we"] + params["be"][0]                   # (B, N, T_OUT)
    return e[..., None] * params["w1"][0] + params["b1"][0]  # (B, N, T_OUT, 3)


def init_params(key):
    # Deterministic synthetic parameters. Weights stored pre-transposed (fan_in, fan_out)
    # relative to torch's (fan_out, fan_in); biases as (1, fan_out).
    ks = jax.random.split(key, 12)
    u = lambda k, shape, s: jax.random.uniform(k, shape, jnp.float32, -s, s)
    return {
        "wb":   u(ks[0], (IN_CH, HIDDEN), 1.0 / IN_CH ** 0.5),
        "bb":   u(ks[1], (1, HIDDEN), 1.0 / IN_CH ** 0.5),
        "wcnn": u(ks[2], (NUM_LAYERS, HIDDEN, HIDDEN), 1.0 / HIDDEN ** 0.5),
        "bcnn": u(ks[3], (NUM_LAYERS, 1, HIDDEN), 1.0 / HIDDEN ** 0.5),
        "wln":  u(ks[4], (HIDDEN, OUT_CH), 1.0 / HIDDEN ** 0.5),
        "bln":  u(ks[5], (1, OUT_CH), 1.0 / HIDDEN ** 0.5),
        "we":   u(ks[6], (T_IN * OUT_CH, T_OUT), 1.0 / (T_IN * OUT_CH) ** 0.5),
        "be":   u(ks[7], (1, T_OUT), 1.0 / (T_IN * OUT_CH) ** 0.5),
        "w1":   u(ks[8], (1, 3), 1.0),
        "b1":   u(ks[9], (1, 3), 1.0),
    }


if __name__ == "__main__":
    key = jax.random.PRNGKey(0)
    pkey, xkey = jax.random.split(key)
    params = init_params(pkey)
    folded = fold_params(params)     # one-time full-model fold, not per-forward cost
    x = jax.random.normal(xkey, (B, N_NODES, T_IN, FEAT), jnp.float32)

    out = jax.jit(pcnn_forward)(x, folded)
    out = jax.block_until_ready(out)

    ref = pcnn_reference(x, params)
    assert out.shape == (B, N_NODES, T_OUT, 3), out.shape
    # Slightly loose tolerance: the full algebraic fold reorders the MXU accumulations
    # relative to the unfolded reference chain.
    assert jnp.allclose(out, ref, atol=1e-3, rtol=1e-3), "mismatch vs pure-JAX reference"

    print("KERNEL_OK")
</pallas_src>

<mosaic_0001>
module attributes {stable_mosaic.version = 11 : i64} {
  func.func @pcnn_fused_kernel(%arg0: memref<2x384xf32, #tpu.memory_space<vmem>>, %arg1: memref<384x96xf32, #tpu.memory_space<vmem>>, %arg2: memref<1x96xf32, #tpu.memory_space<vmem>>, %arg3: memref<2x96xf32, #tpu.memory_space<vmem>>) attributes {dimension_semantics = [], scalar_prefetch = 0 : i64, scratch_operands = 0 : i64, tpu.core_type = #tpu.core_type<tc>} {
    %c0 = arith.constant 0 : index
    %c0_0 = arith.constant 0 : index
    %0 = vector.load %arg0[%c0, %c0_0] : memref<2x384xf32, #tpu.memory_space<vmem>>, vector<2x384xf32>
    %c0_1 = arith.constant 0 : index
    %c0_2 = arith.constant 0 : index
    %1 = vector.load %arg1[%c0_1, %c0_2] : memref<384x96xf32, #tpu.memory_space<vmem>>, vector<384x96xf32>
    %cst = arith.constant dense<0.000000e+00> : vector<2x96xf32>
    %2 = tpu.matmul %0, %1, %cst {dimension_numbers = #tpu.dot_dimension_numbers<[1], [0], [0], [1], [0, 0, 1, 1], [], []>} : vector<2x384xf32>, vector<384x96xf32>, vector<2x96xf32> -> vector<2x96xf32>
    %c0_3 = arith.constant 0 : index
    %c0_4 = arith.constant 0 : index
    %3 = vector.load %arg2[%c0_3, %c0_4] : memref<1x96xf32, #tpu.memory_space<vmem>>, vector<1x96xf32>
    %4 = vector.broadcast %3 : vector<1x96xf32> to vector<2x96xf32>
    %5 = arith.addf %2, %4 : vector<2x96xf32>
    %c0_5 = arith.constant 0 : index
    %c0_6 = arith.constant 0 : index
    %6 = vector.load %arg3[%c0_5, %c0_6] : memref<2x96xf32, #tpu.memory_space<vmem>>, vector<2x96xf32>
    tpu.vector_store %arg3[%c0_5, %c0_6], %5 {strides = array<i32>} : memref<2x96xf32, #tpu.memory_space<vmem>>, vector<2x96xf32>,
    return
  }
}

</mosaic_0001>

<bundles_post_ra>
// kernel: pcnn_forward.1
= control target key start
LH: loop header
LB: loop body
LE: loop exit
PB: predicated region body
PF: predicated region fallthrough
CT: control target
= control target key end

     0   :  { %v385_v3 = vmov 0.0|0.0   ;;  %vm386_vm0 = vmmov 0   ;;  %v387_v8 = vmov 0.0   ;;  %v388_v20 = vmov 1983009808   ;;  %s570_s1 = inlined_call_operand.vmem [shape: f32[384,96], index: 1, kind: input, shape index: {}]   ;;  %s571_s0 = inlined_call_operand.vmem [shape: f32[2,384], index: 0, kind: input, shape index: {}]   ;;  %s572_s2 = inlined_call_operand.vmem [shape: f32[1,96], index: 2, kind: input, shape index: {}]   ;;  %s573_s3 = inlined_call_operand.vmem [shape: f32[2,96], index: 3, kind: output, shape index: {}]  }
   0x1   :  { %v31_v0 = vld [vmem:[%s570_s1 + $0x80] sm:$0xff]  ;;  %v32_v1 = vld [vmem:[%s570_s1 + $0x88] sm:$0xff]  ;;  %356 = vmatprep.subr.bf16.mxu1 %v385_v3  ;;  %v33_v6 = vld [vmem:[%s570_s1 + $0x90] sm:$0xff]  ;;  %321 = vmatprep.mubr.msk.f32.mxu1 %vm386_vm0, %v387_v8  ;;  %v73_v21 = vunpack.c.l.s4 %v388_v20  ;;  %v75_v22 = vlaneseq  ;;  %vm230_vm1 = vcmask 779264  }
   0x2   :  { %v15_v2 = vld [vmem:[%s570_s1] sm:$0xff]  ;;  %v324_v4 = vpack.c.bf16 %v32_v1, %v31_v0  ;;  %v16_v5 = vld [vmem:[%s570_s1 + $0x8] sm:$0xff]  ;;  %v34_v7 = vld [vmem:[%s570_s1 + $0x98] sm:$0xff] }
   0x3   :  { %v326_v9 = vpack.c.bf16 %v16_v5, %v15_v2  ;;  %v328_v10 = vpack.c.bf16 %v34_v7, %v33_v6  ;;  %v17_v11 = vld [vmem:[%s570_s1 + $0x10] sm:$0xff]  ;;  %v18_v12 = vld [vmem:[%s570_s1 + $0x18] sm:$0xff]  ;;  %v47_v13 = vld [vmem:[%s570_s1 + $0x100] sm:$0xff]  ;;  %v74_v33 = vunpack.c.0.s8 %v73_v21  ;;  %v76_v34 = vshrl.u32 %v75_v22, 7 }
   0x4   :  { %325 = vmatprep.subr.bf16.mxu0 %v324_v4  ;;  %v48_v14 = vld [vmem:[%s570_s1 + $0x108] sm:$0xff]  ;;  %v35_v15 = vld [vmem:[%s570_s1 + $0xa0] sm:$0xff]  ;;  %v330_v17 = vpack.c.bf16 %v18_v12, %v17_v11  ;;  %v49_v19 = vld [vmem:[%s570_s1 + $0x110] sm:$0xff] }
   0x5   :  { %v36_v16 = vld [vmem:[%s570_s1 + $0xa8] sm:$0xff]  ;;  %327 = vmatpush3.bf16.msra.mxu0 %v326_v9  ;;  %v357_v18 = vpack.c.bf16 %v48_v14, %v47_v13  ;;  %v19_v24 = vld [vmem:[%s570_s1 + $0x20] sm:$0xff]  ;;  %v50_v26 = vld [vmem:[%s570_s1 + $0x118] sm:$0xff]  ;;  %v77_v44 = vsub.s32 %v74_v33, %v76_v34 }
   0x6   :  { %329 = vmatprep.subr.bf16.mxu0 %v328_v10  ;;  %v332_v23 = vpack.c.bf16 %v36_v16, %v35_v15  ;;  %v20_v25 = vld [vmem:[%s570_s1 + $0x28] sm:$0xff]  ;;  %v360_v27 = vpack.c.bf16 %v50_v26, %v49_v19  ;;  %v37_v28 = vld [vmem:[%s570_s1 + $0xb0] sm:$0xff]  ;;  %v38_v29 = vld [vmem:[%s570_s1 + $0xb8] sm:$0xff] }
   0x7   :  { %358 = vmatpush3.bf16.msra.mxu1 %v357_v18  ;;  %v51_v30 = vld [vmem:[%s570_s1 + $0x120] sm:$0xff]  ;;  %v52_v31 = vld [vmem:[%s570_s1 + $0x128] sm:$0xff]  ;;  %v334_v32 = vpack.c.bf16 %v20_v25, %v19_v24  ;;  %v336_v35 = vpack.c.bf16 %v38_v29, %v37_v28  ;;  %v21_v36 = vld [vmem:[%s570_s1 + $0x30] sm:$0xff] }
   0x8   :  { %359 = vmatprep.subr.bf16.mxu1 %v385_v3  ;;  %v22_v37 = vld [vmem:[%s570_s1 + $0x38] sm:$0xff]  ;;  %v363_v38 = vpack.c.bf16 %v52_v31, %v51_v30  ;;  %v39_v39 = vld [vmem:[%s570_s1 + $0xc0] sm:$0xff]  ;;  %v40_v40 = vld [vmem:[%s570_s1 + $0xc8] sm:$0xff] }
   0x9   :  { %331 = vmatpush3.bf16.msra.mxu0 %v330_v17  ;;  %v53_v41 = vld [vmem:[%s570_s1 + $0x130] sm:$0xff]  ;;  %v54_v42 = vld [vmem:[%s570_s1 + $0x138] sm:$0xff]  ;;  %v338_v43 = vpack.c.bf16 %v22_v37, %v21_v36  ;;  %v340_v45 = vpack.c.bf16 %v40_v40, %v39_v39  ;;  %v23_v46 = vld [vmem:[%s570_s1 + $0x40] sm:$0xff] }
   0xa   :  { %333 = vmatprep.subr.bf16.mxu0 %v332_v23  ;;  %v24_v47 = vld [vmem:[%s570_s1 + $0x48] sm:$0xff]  ;;  %v366_v48 = vpack.c.bf16 %v54_v42, %v53_v41  ;;  %v41_v49 = vld [vmem:[%s570_s1 + $0xd0] sm:$0xff]  ;;  %v42_v50 = vld [vmem:[%s570_s1 + $0xd8] sm:$0xff] }
   0xb   :  { %361 = vmatpush3.bf16.msra.mxu1 %v360_v27  ;;  %v55_v51 = vld [vmem:[%s570_s1 + $0x140] sm:$0xff]  ;;  %v56_v52 = vld [vmem:[%s570_s1 + $0x148] sm:$0xff]  ;;  %v342_v54 = vpack.c.bf16 %v24_v47, %v23_v46  ;;  %v344_v56 = vpack.c.bf16 %v42_v50, %v41_v49  ;;  %v25_v57 = vld [vmem:[%s570_s1 + $0x50] sm:$0xff] }
   0xc   :  { %362 = vmatprep.subr.bf16.mxu1 %v385_v3  ;;  %v14_v53 = vld [vmem:[%s571_s0] sm:$0x3f]  ;;  %v26_v58 = vld [vmem:[%s570_s1 + $0x58] sm:$0xff]  ;;  %v369_v59 = vpack.c.bf16 %v56_v52, %v55_v51  ;;  %v44_v61 = vld [vmem:[%s570_s1 + $0xe8] sm:$0xff] }
   0xd   :  { %335 = vmatpush3.bf16.msra.mxu0 %v334_v32  ;;  %v78_v55 = vrot.slane %v14_v53, %v77_v44  ;;  %v43_v60 = vld [vmem:[%s570_s1 + $0xe0] sm:$0xff]  ;;  %v57_v63 = vld [vmem:[%s570_s1 + $0x150] sm:$0xff]  ;;  %v58_v0 = vld [vmem:[%s570_s1 + $0x158] sm:$0xff]  ;;  %v346_v1 = vpack.c.bf16 %v26_v58, %v25_v57  ;;  %v71_v19 = vcombine.high %v14_v53, %v14_v53 }
   0xe   :  { %337 = vmatprep.subr.bf16.mxu0 %v336_v35  ;;  %v348_v2 = vpack.c.bf16 %v44_v61, %v43_v60  ;;  %v27_v4 = vld [vmem:[%s570_s1 + $0x60] sm:$0xff]  ;;  %v28_v5 = vld [vmem:[%s570_s1 + $0x68] sm:$0xff]  ;;  %v372_v6 = vpack.c.bf16 %v58_v0, %v57_v63  ;;  %v45_v7 = vld [vmem:[%s570_s1 + $0xf0] sm:$0xff] }
   0xf   :  { %364 = vmatpush3.bf16.msra.mxu1 %v363_v38  ;;  %v86_v62 = vcombine.high %v78_v55, %v78_v55  ;;  %v46_v8 = vld [vmem:[%s570_s1 + $0xf8] sm:$0xff]  ;;  %v59_v9 = vld [vmem:[%s570_s1 + $0x160] sm:$0xff]  ;;  %v60_v10 = vld [vmem:[%s570_s1 + $0x168] sm:$0xff]  ;;  %v350_v11 = vpack.c.bf16 %v28_v5, %v27_v4  ;;  %v85_v21 = vrot.slane %v71_v19, %v77_v44 }
  0x10   :  { %365 = vmatprep.subr.bf16.mxu1 %v385_v3  ;;  %v352_v12 = vpack.c.bf16 %v46_v8, %v45_v7  ;;  %v29_v13 = vld [vmem:[%s570_s1 + $0x70] sm:$0xff]  ;;  %v30_v14 = vld [vmem:[%s570_s1 + $0x78] sm:$0xff]  ;;  %v375_v15 = vpack.c.bf16 %v60_v10, %v59_v9  ;;  %v236_v24 = vld [vmem:[%s572_s2] ss:$0 sm:$0xff] }
  0x11   :  { %339 = vmatpush3.bf16.msra.mxu0 %v338_v43  ;;  %154 = vmatprep.mubr.f32.mxu0 %v86_v62  ;;  %v61_v16 = vld [vmem:[%s570_s1 + $0x170] sm:$0xff]  ;;  %v62_v17 = vld [vmem:[%s570_s1 + $0x178] sm:$0xff]  ;;  %v354_v18 = vpack.c.bf16 %v30_v14, %v29_v13 }
  0x12   :  { %341 = vmatprep.subr.bf16.mxu0 %v340_v45  ;;  %v378_v20 = vpack.c.bf16 %v62_v17, %v61_v16 }
  0x13   :  { %367 = vmatpush3.bf16.msra.mxu1 %v366_v48 }
  0x14   :  { %368 = vmatprep.subr.bf16.mxu1 %v385_v3 }
  0x15   :  { %343 = vmatpush3.bf16.msra.mxu0 %v342_v54 }
  0x16   :  { %345 = vmatprep.subr.bf16.mxu0 %v344_v56 }
  0x17   :  { %370 = vmatpush3.bf16.msra.mxu1 %v369_v59 }
  0x18   :  { %371 = vmatprep.subr.bf16.mxu1 %v385_v3 }
  0x19   :  { %347 = vmatpush3.bf16.msra.mxu0 %v346_v1 }
  0x1a   :  { %349 = vmatprep.subr.bf16.mxu0 %v348_v2 }
  0x1b   :  { %373 = vmatpush3.bf16.msra.mxu1 %v372_v6 }
  0x1c   :  { %374 = vmatprep.subr.bf16.mxu1 %v385_v3 }
  0x1d   :  { %351 = vmatpush3.bf16.msra.mxu0 %v350_v11 }
  0x1e   :  { %353 = vmatprep.subr.bf16.mxu0 %v352_v12 }
  0x1f   :  { %376 = vmatpush3.bf16.msra.mxu1 %v375_v15 }
  0x20   :  { %377 = vmatprep.subr.bf16.mxu1 %v385_v3 }
  0x21   :  { %355 = vmatpush3.bf16.msra.mxu0 %v354_v18 }
  0x23   :  { %379 = vmatpush3.bf16.msra.mxu1 %v378_v20 }
  0x24   :  { %155 = vmatmul.mubr.f32.vlgmr.msra.gmra.mrb[0].mxu0 %v78_v55 }
  0x26   :  { %322 = vmatmul.mubr.f32.vlgmr.msra.gmra.mrb[0].mxu1 %v85_v21 }
  0xf7   :  { %v269_v22 = vpop.f32.mrb[0].mxu0 }
  0xf8   :  { %v270_v23 = vpop.f32.mrb[1].mxu0 }
  0xf9   :  { %v271_v25 = vadd.f32 %v270_v23, %v269_v22  ;;  %v226_v26 = vpop.f32.mrb[0].mxu1 }
  0xfa   :  { %v323_v27 = vpop.f32.mrb[1].mxu1 }
  0xfb   :  { %v157_v28 = vadd.f32 %v271_v25, %v236_v24 }
  0xfd   :  { %v227_v29 = vadd.f32 %v226_v26, %v157_v28 }
  0xff   :  { %231 = vst.msk [vmem:[%s573_s3] sm:$0x3] %vm230_vm1, %v227_v29 }

</bundles_post_ra>
